<compile_context>
chip_gen: v5e
topology: v5e:2x2
jax: 0.10.0
libtpu: 0.0.40
codegen_flags: <defaults>
</compile_context>

<pallas_src>
import functools

import jax
import jax.numpy as jnp
from jax.experimental import pallas as pl
from jax.experimental.pallas import tpu as pltpu

NEG_SLOPE = 0.1   # nn.LeakyReLU(0.1)
STRIDE = 1        # BasicBlockVariant default stride (MaxPool2d(1) == identity)
BN_EPS = 1e-5


def _leaky(x):
    return jnp.where(x > 0, x, NEG_SLOPE * x)


def basic_block_kernel(x_ref,
                       w1_ref, b1_ref,
                       w2_ref, b2_ref,
                       w3_ref, b3_ref,
                       o_ref):
    """One image per grid step; everything in the lane-dense (H, W*C) layout.

    x_ref : (1, H, W*C)   f32  input image (lane dim = W*C = 128 at test shape)
    wK_ref: (3, W*C, W*C) bf16 block-tridiagonal conv weights (one per kernel
                               row ky), BN scale folded in.  Column taps and
                               left/right zero padding are encoded in the
                               tridiagonal block structure.
    bK_ref: (1, W*C)      f32  BN bias tiled W times along the lane dim
    o_ref : (1, H, W*C)   f32  lane-dense output (unmasked full-vreg stores)
    """
    _, H, WC = x_ref.shape
    zrow = jnp.zeros((1, WC), jnp.float32)

    def conv_bn(cur, w_ref, b_ref, relu):
        # One-row zero halo top/bottom (value-level, no scratch round trip).
        pad = jnp.concatenate([zrow, cur, zrow], axis=0)          # (H+2, WC)
        acc = None
        for ky in range(3):                                       # 3 MXU matmuls
            lhs = pad[ky:ky + H, :].astype(jnp.bfloat16)          # (H, WC) bf16
            d = jnp.dot(lhs, w_ref[ky],
                        preferred_element_type=jnp.float32)       # f32 accum
            acc = d if acc is None else acc + d
        out = acc + b_ref[...]                                    # folded BN bias
        return _leaky(out) if relu else out

    x = x_ref[0]                                                  # (H, WC) f32
    out = conv_bn(x, w1_ref, b1_ref, relu=True)
    out = conv_bn(out, w2_ref, b2_ref, relu=True)
    out = conv_bn(out, w3_ref, b3_ref, relu=False)
    out = _leaky(out + x)                    # residual add + LeakyReLU(0.1)
    # MaxPool2d(stride) with the default stride=1 is the identity.
    o_ref[0] = out.astype(o_ref.dtype)


@jax.jit
def basic_block_forward_lane(x_lane, w1, b1, w2, b2, w3, b3):
    """Pallas launch on the lane-dense (N, H, W*C) layout."""
    N, H, WC = x_lane.shape

    def fixed(shape):
        nd = len(shape)
        return pl.BlockSpec(shape, lambda n: (0,) * nd)

    in_specs = [
        pl.BlockSpec((1, H, WC), lambda n: (n, 0, 0)),    # x: one image / step
        fixed((3, WC, WC)), fixed((1, WC)),               # conv1 / bn1
        fixed((3, WC, WC)), fixed((1, WC)),               # conv2 / bn2
        fixed((3, WC, WC)), fixed((1, WC)),               # conv3 / bn3
    ]
    out_specs = pl.BlockSpec((1, H, WC), lambda n: (n, 0, 0))

    flops = N * 3 * 3 * 2 * H * WC * WC                   # 3 convs x 3 matmuls
    bytes_accessed = (2 * N * H * WC * 4                  # activations in + out
                      + 3 * 3 * WC * WC * 2               # bf16 weights
                      + 3 * WC * 4)                       # biases

    return pl.pallas_call(
        basic_block_kernel,
        out_shape=jax.ShapeDtypeStruct((N, H, WC), x_lane.dtype),
        grid_spec=pltpu.PrefetchScalarGridSpec(
            num_scalar_prefetch=0,
            grid=(N,),
            in_specs=in_specs,
            out_specs=out_specs,
        ),
        compiler_params=pltpu.CompilerParams(
            dimension_semantics=("parallel",)),            # both TCs on v7x
        cost_estimate=pl.CostEstimate(
            flops=flops, transcendentals=0, bytes_accessed=bytes_accessed),
    )(x_lane, w1, b1, w2, b2, w3, b3)


def basic_block_forward(x_nchw, kernel_params):
    """PyTorch-facing wrapper: NCHW in, NCHW out (layout plumbing only)."""
    N, C, H, W = x_nchw.shape
    x_lane = jnp.transpose(x_nchw, (0, 2, 3, 1)).reshape(N, H, W * C)
    out_lane = basic_block_forward_lane(x_lane, *kernel_params)
    return jnp.transpose(out_lane.reshape(N, H, W, C), (0, 3, 1, 2))


# ---------------- pure-JAX reference (for correctness check) ----------------
def reference_forward_nhwc(x_nhwc, ref_params):
    """Reference with the same bf16-weight / f32-accumulate numerics."""
    w1, b1, w2, b2, w3, b3 = ref_params

    def conv_bn(x, w_hwio, bias, relu):
        y = jax.lax.conv_general_dilated(
            x.astype(jnp.bfloat16), w_hwio,
            window_strides=(1, 1), padding=((1, 1), (1, 1)),
            dimension_numbers=('NHWC', 'HWIO', 'NHWC'),
            preferred_element_type=jnp.float32)
        y = y + bias.reshape(1, 1, 1, -1)
        return _leaky(y) if relu else y

    out = conv_bn(x_nhwc, w1, b1, True)
    out = conv_bn(out, w2, b2, True)
    out = conv_bn(out, w3, b3, False)
    return _leaky(out + x_nhwc)      # stride=1 -> maxpool is identity


# ---------------- deterministic parameter construction ----------------
def make_params(key, c, w):
    """Builds deterministic conv/BN params.

    Returns:
      kernel_params: (w1, b1, w2, b2, w3, b3) for the Pallas kernel, where wK
        is a (3, W*C, W*C) bf16 block-tridiagonal matrix per kernel row (BN
        scale folded in, kx taps + column zero-padding encoded in the block
        structure) and bK is the (1, W*C) f32 BN bias tiled over W.
      ref_params: the same weights in plain (3, 3, Cin, Cout) bf16 HWIO form
        plus the (C,) f32 biases, for the pure-JAX reference.
    """
    keys = jax.random.split(key, 15)

    def conv_and_bn(kw, kg, kb, km, kv):
        # conv3x3 weight in PyTorch layout (Cout, Cin, 3, 3), bias=False
        w_pt = jax.random.normal(kw, (c, c, 3, 3), jnp.float32) * (
            2.0 / (9 * c)) ** 0.5
        gamma = jax.random.uniform(kg, (c,), jnp.float32, 0.5, 1.5)
        beta = jax.random.normal(kb, (c,), jnp.float32) * 0.1
        mean = jax.random.normal(km, (c,), jnp.float32) * 0.1
        var = jax.random.uniform(kv, (c,), jnp.float32, 0.5, 1.5)
        scale = gamma / jnp.sqrt(var + BN_EPS)
        bias = beta - mean * scale
        # HWIO weights with BN scale folded into Cout, rounded once to the
        # bf16 values that actually reach the MXU.
        w_hwio = jnp.transpose(w_pt, (2, 3, 1, 0)) * scale.reshape(1, 1, 1, c)
        return w_hwio.astype(jnp.bfloat16), bias

    def to_tridiag(w_hwio_bf16):
        # Wtri[ky][w'*C + ci, v*C + co] = w[ky, w'-v+1, ci, co] for |w'-v| <= 1
        wf = w_hwio_bf16.astype(jnp.float32)
        per_ky = []
        for ky in range(3):
            m = sum(jnp.kron(jnp.eye(w, k=1 - kx, dtype=jnp.float32),
                             wf[ky, kx])
                    for kx in range(3))
            per_ky.append(m)
        return jnp.stack(per_ky, axis=0).astype(jnp.bfloat16)  # (3, W*C, W*C)

    kernel_params, ref_params = [], []
    for i in range(3):
        w_hwio_bf16, bias = conv_and_bn(*keys[5 * i:5 * (i + 1)])
        kernel_params += [to_tridiag(w_hwio_bf16),
                          jnp.tile(bias, w).reshape(1, w * c)]
        ref_params += [w_hwio_bf16, bias]
    return tuple(kernel_params), tuple(ref_params)


if __name__ == "__main__":
    N, C, H, W = 2, 8, 16, 16        # inplanes == planes, W*C = 128 lanes
    root = jax.random.PRNGKey(0)
    k_x, k_p = jax.random.split(root)

    x_nchw = jax.random.normal(k_x, (N, C, H, W), jnp.float32)
    kernel_params, ref_params = make_params(k_p, C, W)

    out_nchw = basic_block_forward(x_nchw, kernel_params)
    out_nchw = jax.block_until_ready(out_nchw)

    # correctness check against a pure-JAX reference with matching numerics
    ref_nhwc = reference_forward_nhwc(
        jnp.transpose(x_nchw, (0, 2, 3, 1)), ref_params)
    ref_nchw = jnp.transpose(ref_nhwc, (0, 3, 1, 2))

    err = float(jnp.max(jnp.abs(out_nchw - ref_nchw)))
    assert out_nchw.shape == (N, C, H // STRIDE, W // STRIDE), out_nchw.shape
    assert err < 1e-2, f"max abs error {err}"

    print("KERNEL_OK")
</pallas_src>

<mosaic_0001>
module attributes {stable_mosaic.version = 11 : i64} {
  func.func @basic_block_kernel(%arg0: i32, %arg1: memref<1x16x128xf32, #tpu.memory_space<vmem>>, %arg2: memref<3x128x128xbf16, #tpu.memory_space<vmem>>, %arg3: memref<1x128xf32, #tpu.memory_space<vmem>>, %arg4: memref<3x128x128xbf16, #tpu.memory_space<vmem>>, %arg5: memref<1x128xf32, #tpu.memory_space<vmem>>, %arg6: memref<3x128x128xbf16, #tpu.memory_space<vmem>>, %arg7: memref<1x128xf32, #tpu.memory_space<vmem>>, %arg8: memref<1x16x128xf32, #tpu.memory_space<vmem>>) attributes {dimension_semantics = [#tpu.dimension_semantics<parallel>], iteration_bounds = array<i64: 2>, scalar_prefetch = 0 : i64, scratch_operands = 0 : i64, tpu.core_type = #tpu.core_type<tc>, window_params = [{transform_indices = @transform_0, window_bounds = array<i64: 1, 16, 128>}, {pipeline_mode = #tpu.pipeline_mode<synchronous>, transform_indices = @transform_1, window_bounds = array<i64: 3, 128, 128>}, {pipeline_mode = #tpu.pipeline_mode<synchronous>, transform_indices = @transform_2, window_bounds = array<i64: 1, 128>}, {pipeline_mode = #tpu.pipeline_mode<synchronous>, transform_indices = @transform_3, window_bounds = array<i64: 3, 128, 128>}, {pipeline_mode = #tpu.pipeline_mode<synchronous>, transform_indices = @transform_4, window_bounds = array<i64: 1, 128>}, {pipeline_mode = #tpu.pipeline_mode<synchronous>, transform_indices = @transform_5, window_bounds = array<i64: 3, 128, 128>}, {pipeline_mode = #tpu.pipeline_mode<synchronous>, transform_indices = @transform_6, window_bounds = array<i64: 1, 128>}, {transform_indices = @transform_7, window_bounds = array<i64: 1, 16, 128>}]} {
    %cst = arith.constant 0.000000e+00 : f32
    %0 = vector.broadcast %cst : f32 to vector<1x128xf32>
    %c0 = arith.constant 0 : index
    %c0_0 = arith.constant 0 : index
    %c0_1 = arith.constant 0 : index
    %1 = vector.load %arg1[%c0, %c0_0, %c0_1] : memref<1x16x128xf32, #tpu.memory_space<vmem>>, vector<1x16x128xf32>
    %2 = vector.shape_cast %1 : vector<1x16x128xf32> to vector<16x128xf32>
    %3 = tpu.concatenate %0, %2, %0 in 0 : vector<1x128xf32>, vector<16x128xf32>, vector<1x128xf32> -> vector<18x128xf32>
    %4 = vector.extract_strided_slice %3 {offsets = [0, 0], sizes = [16, 128], strides = [1, 1]} : vector<18x128xf32> to vector<16x128xf32>
    %5 = arith.truncf %4 : vector<16x128xf32> to vector<16x128xbf16>
    %c0_2 = arith.constant 0 : index
    %c0_3 = arith.constant 0 : index
    %c0_4 = arith.constant 0 : index
    %6 = vector.load %arg2[%c0_2, %c0_3, %c0_4] : memref<3x128x128xbf16, #tpu.memory_space<vmem>>, vector<1x128x128xbf16>
    %7 = vector.shape_cast %6 : vector<1x128x128xbf16> to vector<128x128xbf16>
    %cst_5 = arith.constant dense<0.000000e+00> : vector<16x128xf32>
    %8 = tpu.matmul %5, %7, %cst_5 {dimension_numbers = #tpu.dot_dimension_numbers<[1], [0], [0], [1], [0, 0, 1, 1], [], []>} : vector<16x128xbf16>, vector<128x128xbf16>, vector<16x128xf32> -> vector<16x128xf32>
    %9 = vector.extract_strided_slice %3 {offsets = [1, 0], sizes = [16, 128], strides = [1, 1]} : vector<18x128xf32> to vector<16x128xf32>
    %10 = arith.truncf %9 : vector<16x128xf32> to vector<16x128xbf16>
    %c1 = arith.constant 1 : index
    %c0_6 = arith.constant 0 : index
    %c0_7 = arith.constant 0 : index
    %11 = vector.load %arg2[%c1, %c0_6, %c0_7] : memref<3x128x128xbf16, #tpu.memory_space<vmem>>, vector<1x128x128xbf16>
    %12 = vector.shape_cast %11 : vector<1x128x128xbf16> to vector<128x128xbf16>
    %cst_8 = arith.constant dense<0.000000e+00> : vector<16x128xf32>
    %13 = tpu.matmul %10, %12, %cst_8 {dimension_numbers = #tpu.dot_dimension_numbers<[1], [0], [0], [1], [0, 0, 1, 1], [], []>} : vector<16x128xbf16>, vector<128x128xbf16>, vector<16x128xf32> -> vector<16x128xf32>
    %14 = arith.addf %8, %13 : vector<16x128xf32>
    %15 = vector.extract_strided_slice %3 {offsets = [2, 0], sizes = [16, 128], strides = [1, 1]} : vector<18x128xf32> to vector<16x128xf32>
    %16 = arith.truncf %15 : vector<16x128xf32> to vector<16x128xbf16>
    %c2 = arith.constant 2 : index
    %c0_9 = arith.constant 0 : index
    %c0_10 = arith.constant 0 : index
    %17 = vector.load %arg2[%c2, %c0_9, %c0_10] : memref<3x128x128xbf16, #tpu.memory_space<vmem>>, vector<1x128x128xbf16>
    %18 = vector.shape_cast %17 : vector<1x128x128xbf16> to vector<128x128xbf16>
    %cst_11 = arith.constant dense<0.000000e+00> : vector<16x128xf32>
    %19 = tpu.matmul %16, %18, %cst_11 {dimension_numbers = #tpu.dot_dimension_numbers<[1], [0], [0], [1], [0, 0, 1, 1], [], []>} : vector<16x128xbf16>, vector<128x128xbf16>, vector<16x128xf32> -> vector<16x128xf32>
    %20 = arith.addf %14, %19 : vector<16x128xf32>
    %c0_12 = arith.constant 0 : index
    %c0_13 = arith.constant 0 : index
    %21 = vector.load %arg3[%c0_12, %c0_13] : memref<1x128xf32, #tpu.memory_space<vmem>>, vector<1x128xf32>
    %22 = vector.broadcast %21 : vector<1x128xf32> to vector<16x128xf32>
    %23 = arith.addf %20, %22 : vector<16x128xf32>
    %cst_14 = arith.constant 0.000000e+00 : f32
    %24 = vector.broadcast %cst_14 : f32 to vector<16x128xf32>
    %25 = arith.cmpf ogt, %23, %24 : vector<16x128xf32>
    %cst_15 = arith.constant 1.000000e-01 : f32
    %26 = vector.broadcast %cst_15 : f32 to vector<16x128xf32>
    %27 = arith.mulf %26, %23 : vector<16x128xf32>
    %28 = arith.select %25, %23, %27 : vector<16x128xi1>, vector<16x128xf32>
    %29 = tpu.concatenate %0, %28, %0 in 0 : vector<1x128xf32>, vector<16x128xf32>, vector<1x128xf32> -> vector<18x128xf32>
    %30 = vector.extract_strided_slice %29 {offsets = [0, 0], sizes = [16, 128], strides = [1, 1]} : vector<18x128xf32> to vector<16x128xf32>
    %31 = arith.truncf %30 : vector<16x128xf32> to vector<16x128xbf16>
    %c0_16 = arith.constant 0 : index
    %c0_17 = arith.constant 0 : index
    %c0_18 = arith.constant 0 : index
    %32 = vector.load %arg4[%c0_16, %c0_17, %c0_18] : memref<3x128x128xbf16, #tpu.memory_space<vmem>>, vector<1x128x128xbf16>
    %33 = vector.shape_cast %32 : vector<1x128x128xbf16> to vector<128x128xbf16>
    %cst_19 = arith.constant dense<0.000000e+00> : vector<16x128xf32>
    %34 = tpu.matmul %31, %33, %cst_19 {dimension_numbers = #tpu.dot_dimension_numbers<[1], [0], [0], [1], [0, 0, 1, 1], [], []>} : vector<16x128xbf16>, vector<128x128xbf16>, vector<16x128xf32> -> vector<16x128xf32>
    %35 = vector.extract_strided_slice %29 {offsets = [1, 0], sizes = [16, 128], strides = [1, 1]} : vector<18x128xf32> to vector<16x128xf32>
    %36 = arith.truncf %35 : vector<16x128xf32> to vector<16x128xbf16>
    %c1_20 = arith.constant 1 : index
    %c0_21 = arith.constant 0 : index
    %c0_22 = arith.constant 0 : index
    %37 = vector.load %arg4[%c1_20, %c0_21, %c0_22] : memref<3x128x128xbf16, #tpu.memory_space<vmem>>, vector<1x128x128xbf16>
    %38 = vector.shape_cast %37 : vector<1x128x128xbf16> to vector<128x128xbf16>
    %cst_23 = arith.constant dense<0.000000e+00> : vector<16x128xf32>
    %39 = tpu.matmul %36, %38, %cst_23 {dimension_numbers = #tpu.dot_dimension_numbers<[1], [0], [0], [1], [0, 0, 1, 1], [], []>} : vector<16x128xbf16>, vector<128x128xbf16>, vector<16x128xf32> -> vector<16x128xf32>
    %40 = arith.addf %34, %39 : vector<16x128xf32>
    %41 = vector.extract_strided_slice %29 {offsets = [2, 0], sizes = [16, 128], strides = [1, 1]} : vector<18x128xf32> to vector<16x128xf32>
    %42 = arith.truncf %41 : vector<16x128xf32> to vector<16x128xbf16>
    %c2_24 = arith.constant 2 : index
    %c0_25 = arith.constant 0 : index
    %c0_26 = arith.constant 0 : index
    %43 = vector.load %arg4[%c2_24, %c0_25, %c0_26] : memref<3x128x128xbf16, #tpu.memory_space<vmem>>, vector<1x128x128xbf16>
    %44 = vector.shape_cast %43 : vector<1x128x128xbf16> to vector<128x128xbf16>
    %cst_27 = arith.constant dense<0.000000e+00> : vector<16x128xf32>
    %45 = tpu.matmul %42, %44, %cst_27 {dimension_numbers = #tpu.dot_dimension_numbers<[1], [0], [0], [1], [0, 0, 1, 1], [], []>} : vector<16x128xbf16>, vector<128x128xbf16>, vector<16x128xf32> -> vector<16x128xf32>
    %46 = arith.addf %40, %45 : vector<16x128xf32>
    %c0_28 = arith.constant 0 : index
    %c0_29 = arith.constant 0 : index
    %47 = vector.load %arg5[%c0_28, %c0_29] : memref<1x128xf32, #tpu.memory_space<vmem>>, vector<1x128xf32>
    %48 = vector.broadcast %47 : vector<1x128xf32> to vector<16x128xf32>
    %49 = arith.addf %46, %48 : vector<16x128xf32>
    %cst_30 = arith.constant 0.000000e+00 : f32
    %50 = vector.broadcast %cst_30 : f32 to vector<16x128xf32>
    %51 = arith.cmpf ogt, %49, %50 : vector<16x128xf32>
    %cst_31 = arith.constant 1.000000e-01 : f32
    %52 = vector.broadcast %cst_31 : f32 to vector<16x128xf32>
    %53 = arith.mulf %52, %49 : vector<16x128xf32>
    %54 = arith.select %51, %49, %53 : vector<16x128xi1>, vector<16x128xf32>
    %55 = tpu.concatenate %0, %54, %0 in 0 : vector<1x128xf32>, vector<16x128xf32>, vector<1x128xf32> -> vector<18x128xf32>
    %56 = vector.extract_strided_slice %55 {offsets = [0, 0], sizes = [16, 128], strides = [1, 1]} : vector<18x128xf32> to vector<16x128xf32>
    %57 = arith.truncf %56 : vector<16x128xf32> to vector<16x128xbf16>
    %c0_32 = arith.constant 0 : index
    %c0_33 = arith.constant 0 : index
    %c0_34 = arith.constant 0 : index
    %58 = vector.load %arg6[%c0_32, %c0_33, %c0_34] : memref<3x128x128xbf16, #tpu.memory_space<vmem>>, vector<1x128x128xbf16>
    %59 = vector.shape_cast %58 : vector<1x128x128xbf16> to vector<128x128xbf16>
    %cst_35 = arith.constant dense<0.000000e+00> : vector<16x128xf32>
    %60 = tpu.matmul %57, %59, %cst_35 {dimension_numbers = #tpu.dot_dimension_numbers<[1], [0], [0], [1], [0, 0, 1, 1], [], []>} : vector<16x128xbf16>, vector<128x128xbf16>, vector<16x128xf32> -> vector<16x128xf32>
    %61 = vector.extract_strided_slice %55 {offsets = [1, 0], sizes = [16, 128], strides = [1, 1]} : vector<18x128xf32> to vector<16x128xf32>
    %62 = arith.truncf %61 : vector<16x128xf32> to vector<16x128xbf16>
    %c1_36 = arith.constant 1 : index
    %c0_37 = arith.constant 0 : index
    %c0_38 = arith.constant 0 : index
    %63 = vector.load %arg6[%c1_36, %c0_37, %c0_38] : memref<3x128x128xbf16, #tpu.memory_space<vmem>>, vector<1x128x128xbf16>
    %64 = vector.shape_cast %63 : vector<1x128x128xbf16> to vector<128x128xbf16>
    %cst_39 = arith.constant dense<0.000000e+00> : vector<16x128xf32>
    %65 = tpu.matmul %62, %64, %cst_39 {dimension_numbers = #tpu.dot_dimension_numbers<[1], [0], [0], [1], [0, 0, 1, 1], [], []>} : vector<16x128xbf16>, vector<128x128xbf16>, vector<16x128xf32> -> vector<16x128xf32>
    %66 = arith.addf %60, %65 : vector<16x128xf32>
    %67 = vector.extract_strided_slice %55 {offsets = [2, 0], sizes = [16, 128], strides = [1, 1]} : vector<18x128xf32> to vector<16x128xf32>
    %68 = arith.truncf %67 : vector<16x128xf32> to vector<16x128xbf16>
    %c2_40 = arith.constant 2 : index
    %c0_41 = arith.constant 0 : index
    %c0_42 = arith.constant 0 : index
    %69 = vector.load %arg6[%c2_40, %c0_41, %c0_42] : memref<3x128x128xbf16, #tpu.memory_space<vmem>>, vector<1x128x128xbf16>
    %70 = vector.shape_cast %69 : vector<1x128x128xbf16> to vector<128x128xbf16>
    %cst_43 = arith.constant dense<0.000000e+00> : vector<16x128xf32>
    %71 = tpu.matmul %68, %70, %cst_43 {dimension_numbers = #tpu.dot_dimension_numbers<[1], [0], [0], [1], [0, 0, 1, 1], [], []>} : vector<16x128xbf16>, vector<128x128xbf16>, vector<16x128xf32> -> vector<16x128xf32>
    %72 = arith.addf %66, %71 : vector<16x128xf32>
    %c0_44 = arith.constant 0 : index
    %c0_45 = arith.constant 0 : index
    %73 = vector.load %arg7[%c0_44, %c0_45] : memref<1x128xf32, #tpu.memory_space<vmem>>, vector<1x128xf32>
    %74 = vector.broadcast %73 : vector<1x128xf32> to vector<16x128xf32>
    %75 = arith.addf %72, %74 : vector<16x128xf32>
    %76 = arith.addf %75, %2 : vector<16x128xf32>
    %cst_46 = arith.constant 0.000000e+00 : f32
    %77 = vector.broadcast %cst_46 : f32 to vector<16x128xf32>
    %78 = arith.cmpf ogt, %76, %77 : vector<16x128xf32>
    %cst_47 = arith.constant 1.000000e-01 : f32
    %79 = vector.broadcast %cst_47 : f32 to vector<16x128xf32>
    %80 = arith.mulf %79, %76 : vector<16x128xf32>
    %81 = arith.select %78, %76, %80 : vector<16x128xi1>, vector<16x128xf32>
    %c0_48 = arith.constant 0 : index
    %c0_49 = arith.constant 0 : index
    %c0_50 = arith.constant 0 : index
    %82 = vector.load %arg8[%c0_48, %c0_49, %c0_50] : memref<1x16x128xf32, #tpu.memory_space<vmem>>, vector<1x16x128xf32>
    %83 = vector.shape_cast %82 : vector<1x16x128xf32> to vector<16x128xf32>
    %84 = vector.shape_cast %81 : vector<16x128xf32> to vector<1x16x128xf32>
    tpu.vector_store %arg8[%c0_48, %c0_49, %c0_50], %84 {strides = array<i32>} : memref<1x16x128xf32, #tpu.memory_space<vmem>>, vector<1x16x128xf32>,
    return
  }
  func.func @transform_0(%arg0: i32) -> (i32, i32, i32) {
    %c0_i32 = arith.constant 0 : i32
    %c0_i32_0 = arith.constant 0 : i32
    %c0_i32_1 = arith.constant 0 : i32
    return %arg0, %c0_i32, %c0_i32_0 : i32, i32, i32
  }
  func.func @transform_1(%arg0: i32) -> (i32, i32, i32) {
    %c0_i32 = arith.constant 0 : i32
    %c0_i32_0 = arith.constant 0 : i32
    %c0_i32_1 = arith.constant 0 : i32
    %c0_i32_2 = arith.constant 0 : i32
    return %c0_i32, %c0_i32_0, %c0_i32_1 : i32, i32, i32
  }
  func.func @transform_2(%arg0: i32) -> (i32, i32) {
    %c0_i32 = arith.constant 0 : i32
    %c0_i32_0 = arith.constant 0 : i32
    %c0_i32_1 = arith.constant 0 : i32
    return %c0_i32, %c0_i32_0 : i32, i32
  }
  func.func @transform_3(%arg0: i32) -> (i32, i32, i32) {
    %c0_i32 = arith.constant 0 : i32
    %c0_i32_0 = arith.constant 0 : i32
    %c0_i32_1 = arith.constant 0 : i32
    %c0_i32_2 = arith.constant 0 : i32
    return %c0_i32, %c0_i32_0, %c0_i32_1 : i32, i32, i32
  }
  func.func @transform_4(%arg0: i32) -> (i32, i32) {
    %c0_i32 = arith.constant 0 : i32
    %c0_i32_0 = arith.constant 0 : i32
    %c0_i32_1 = arith.constant 0 : i32
    return %c0_i32, %c0_i32_0 : i32, i32
  }
  func.func @transform_5(%arg0: i32) -> (i32, i32, i32) {
    %c0_i32 = arith.constant 0 : i32
    %c0_i32_0 = arith.constant 0 : i32
    %c0_i32_1 = arith.constant 0 : i32
    %c0_i32_2 = arith.constant 0 : i32
    return %c0_i32, %c0_i32_0, %c0_i32_1 : i32, i32, i32
  }
  func.func @transform_6(%arg0: i32) -> (i32, i32) {
    %c0_i32 = arith.constant 0 : i32
    %c0_i32_0 = arith.constant 0 : i32
    %c0_i32_1 = arith.constant 0 : i32
    return %c0_i32, %c0_i32_0 : i32, i32
  }
  func.func @transform_7(%arg0: i32) -> (i32, i32, i32) {
    %c0_i32 = arith.constant 0 : i32
    %c0_i32_0 = arith.constant 0 : i32
    %c0_i32_1 = arith.constant 0 : i32
    return %arg0, %c0_i32, %c0_i32_0 : i32, i32, i32
  }
}

</mosaic_0001>

<bundles_post_ra>
// kernel: basic_block_forward_lane.1
= control target key start
LH: loop header
LB: loop body
LE: loop exit
PB: predicated region body
PF: predicated region fallthrough
CT: control target
= control target key end

     0   :  { %s2253_s0 = inlined_call_operand.hbm [shape: f32[2,16,128], index: 0, kind: input, shape index: {}]   ;;  %s2254_s1 = inlined_call_operand.hbm [shape: bf16[3,128,128], index: 1, kind: input, shape index: {}]   ;;  %s2255_s2 = inlined_call_operand.vmem [shape: f32[1,128], index: 2, kind: input, shape index: {}]   ;;  %s2256_s3 = inlined_call_operand.hbm [shape: bf16[3,128,128], index: 3, kind: input, shape index: {}]   ;;  %s2257_s4 = inlined_call_operand.vmem [shape: f32[1,128], index: 4, kind: input, shape index: {}]   ;;  %s2258_s5 = inlined_call_operand.hbm [shape: bf16[3,128,128], index: 5, kind: input, shape index: {}]   ;;  %s2259_s6 = inlined_call_operand.vmem [shape: f32[1,128], index: 6, kind: input, shape index: {}]   ;;  %s2260_s7 = inlined_call_operand.hbm [shape: f32[2,16,128], index: 7, kind: output, shape index: {}]  }
   0x1   :  { %2261 = sst [smem:[#allocation15_spill]] %s2254_s1 }
   0x2   :  { %12 = vsyncpa [#allocation3], 0 }
   0x3   :  { %14 = vsyncpa [#allocation3 + $0x1], 0 }
   0x4   :  { %15 = vsyncpa [#allocation6], 0 }
   0x5   :  { %16 = vsyncpa [#allocation9], 0 }
   0x6   :  { %17 = vsyncpa [#allocation4], 0 }
   0x7   :  { %19 = vsyncpa [#allocation4 + $0x1], 0  ;;  %s2046_s24 = smov 0   ;;  %s2048_s25 = smov 0  }
   0x8   :  { %s2050_s26 = smov 0   ;;  %s2052_s27 = smov 0  }
   0x9 LB: > { %s2067_s28 = sadd.s32 4294967295, %s1994_s27   ;;  %s1319_s29 = sadd.s32 4294967294, %s1994_s27   ;;  %s1994_s27 = sphi %s2052_s27, %s2275_s27   ;;  %s1990_s26 = sphi %s2050_s26, %s2274_s26   ;;  %s1986_s25 = sphi %s2048_s25, %s2273_s25   ;;  %s1982_s24 = sphi %s2046_s24, %s2272_s24  }
   0xa   : > { %p45_p0 = scmp.ne.s32.totalorder %s1986_s25, %s1982_s24  ;;  %p46_p1 = scmp.eq.s32.totalorder %s2067_s28, 0 }
   0xb   : > { %p195_p2 = scmp.eq.s32.totalorder %s2067_s28, 1  ;;  %p201_p3 = scmp.eq.s32.totalorder %s1319_s29, 1 }
   0xc   : > { %p2076_p4 = por %p46_p1, %p45_p0  ;;  %p1320_p5 = scmp.ge.s32.totalorder %s1994_s27, 1 }
   0xd   : > { %p2081_p6 = por %p201_p3, %p45_p0  ;;  %p208_p7 = scmp.lt.s32.totalorder %s1994_s27, 3 }
   0xe   : > { %s2264_s1 = sld [smem:[#allocation15_spill]]  ;;  %s1996_s13 = smov [#allocation5]  }
   0xf   : > { %p2089_p8 = pnand %p1320_p5, %p208_p7  ;;  %s221_s14 = sshll.u32 %s1996_s13, 4  ;;  %s222_s14 = int_to_ptr.vmem [resolvable:$true] %s221_s14 }
  0x10   : > { %s236_s18 = sshll.u32 %s2256_s3, 4  ;;  %s1997_s19 = smov 64   ;;  %s237_s18 = int_to_ptr.hbm [resolvable:$true] %s236_s18 }
  0x11   : > { %p1729_p9 = pneg %p2089_p8  ;;  %s1998_s20 = smov 4  }
  0x12   : > { %s1999_s21 = smov [#allocation7]   ;;  %s253_s9 = sshll.u32 %s2258_s5, 4  ;;  %s254_s9 = int_to_ptr.hbm [resolvable:$true] %s253_s9 }
  0x13   : > { %p2097_p10 = pnand %p1729_p9, %p46_p1  ;;  %s238_s22 = sshll.u32 %s1999_s21, 4  ;;  %s239_s22 = int_to_ptr.vmem [resolvable:$true] %s238_s22 }
  0x14   : > { %s219_s11 = sshll.u32 %s2264_s1, 4  ;;  %s2000_s10 = smov [#allocation8]   ;;  %s220_s11 = int_to_ptr.hbm [resolvable:$true] %s219_s11 }
  0x15   : > { %1732 = dma.hbm_to_vmem [thread:$0]  (!%p2097_p10), %s220_s11, 3072, %s222_s14, [#allocation6], %s1997_s19, %s1997_s19, %s1998_s20  }
  0x16   : > { %1735 = dma.hbm_to_vmem [thread:$0]  (!%p2097_p10), %s237_s18, 3072, %s239_s22, [#allocation6], %s1997_s19, %s1997_s19, %s1998_s20  }
  0x17   : > { %s255_s13 = sshll.u32 %s2000_s10, 4  ;;  %s2113_s11 = sadd.s32 1, %s1994_s27   ;;  %s256_s13 = int_to_ptr.vmem [resolvable:$true] %s255_s13 }
  0x18   : > { %1738 = dma.hbm_to_vmem [thread:$0]  (!%p2097_p10), %s254_s9, 3072, %s256_s13, [#allocation9], %s1997_s19, %s1997_s19, %s1998_s20  }
  0x19   : > { %s29_s14 = ssub.s32 %s1994_s27, %s2113_s11  ;;  %s32_s16 = sadd.s32 1, %s1990_s26 }
  0x1a   : > { %p30_p12 = scmp.eq.s32.totalorder %s29_s14, 0  ;;  %p39_p13 = scmp.ne.s32.totalorder %s1990_s26, %s1986_s25 }
  0x1b   : > { %p40_p0 = scmp.eq.s32.totalorder %s1994_s27, 0  ;;  %p1750_p3 = scmp.lt.s32.totalorder %s1994_s27, 2 }
  0x1c   : > { %s2125_s17 = scalar_select %p30_p12, %s1990_s26, %s32_s16  }
  0x1d   : > { %p41_p5 = por %p40_p0, %p39_p13  ;;  %p2129_p7 = por %p195_p2, %p39_p13 }
  0x1e   : > { %s272_s21 = sand.u32 1, %s1990_s26   ;;  %s1639_s22 = sshll.u32 %s1994_s27, 4 }
  0x1f   : > { %s1325_s15 = sshll.u32 %s272_s21, 4  ;;  %s281_s20 = scalar_lea.hbm %s2253_s0, %s1639_s22 }
  0x20   : > { %s282_s29 = sshll.u32 %s281_s20, 4  ;;  %s276_s9 = scalar_lea.vmem [#allocation2], %s1325_s15  ;;  %s283_s29 = int_to_ptr.hbm [resolvable:$true] %s282_s29 }
  0x21   : > { %s284_s10 = sshll.u32 %s276_s9, 4  ;;  %p2140_p9 = pnand %p1750_p3, %p41_p5  ;;  %s285_s10 = int_to_ptr.vmem [resolvable:$true] %s284_s10 }
  0x22   : > { %s273_s14 = scalar_lea.sflag [#allocation3], %s272_s21  ;;  %s1890_s16 = sshra.s32 %s283_s29, 4  ;;  %s1891_s16 = int_to_ptr.hbm [resolvable:$true] %s1890_s16 }
  0x23   : > { %s1892_s1 = scalar_lea.hbm %s1891_s16, 16  ;;  %p1894_p10 = pneg %p2140_p9 }
  0x24   : > { %p1893_p2 = scmp.ne.s32.totalorder %s1891_s16, %s1892_s1  ;;  %s1897_s23 = scalar_lea.hbm %s2253_s0, 32 }
  0x25   : > { %p1898_p0 = scmp.lt.s32.totalorder %s1891_s16, %s2253_s0  ;;  %p1899_p3 = scmp.lt.s32.totalorder %s1897_s23, %s1892_s1 }
  0x26   : > { %p1895_p12 = pnand %p1894_p10, %p1893_p2 }
  0x27   : > { %p1900_p5 = por %p1899_p3, %p1898_p0 }
  0x28   : > { %p1896_p13 = pneg %p1895_p12 }
  0x2a   : > { %p1901_p11 = pnand %p1900_p5, %p1896_p13 }
  0x2c   : > { %1904 = shalt.err (!%p1901_p11)
}
  0x2d   : > { %s2001_s21 = smov 128   ;;  %s2002_s9 = smov 8  }
  0x2e   : > { %1742 = dma.hbm_to_vmem [thread:$0]  (!%p2140_p9), %s283_s29, 256, %s285_s10, %s273_s14, %s2001_s21, %s2001_s21, %s2002_s9  }
  0x2f   : > { %296 = sbr.rel (%p2089_p8) target bundleno = 566 (0x236), region = 48  ;;  %s2157_s22 = sand.u32 (!%p2089_p8), 1, %s1986_s25  }
  0x30   : > { %s1329_s16 = sshll.u32 (!%p2089_p8), %s2157_s22, 4  ;;  %s299_s1 = scalar_lea.sflag (!%p2089_p8), [#allocation3], %s2157_s22 }
  0x31   : > { %s302_s15 = scalar_lea.vmem (!%p2089_p8), [#allocation2], %s1329_s16 }
  0x34   : > { %1965 = dma.done.wait (%p2076_p4), %s299_s1, 256  }
  0x35   : > { %1967 = vsyncadd (%p2076_p4), %s299_s1, 4294967040 }
  0x36   : > { %1969 = dma.done.wait (%p46_p1), [#allocation6], 6144  }
  0x37   : > { %1971 = vsyncadd (%p46_p1), [#allocation6], 4294961152 }
  0x38   : > { %1973 = dma.done.wait (%p46_p1), [#allocation9], 3072  }
  0x39   : > { %1975 = vsyncadd (%p46_p1), [#allocation9], 4294964224  ;;  %v1655_v0 = vld [vmem:[#allocation5 + $0x78] sm:$0xff]  ;;  %v1654_v3 = vld [vmem:[#allocation5 + $0x70] sm:$0xff]  ;;  %vm353_vm0 = vcmask 1040384   ;;  %vm554_vm3 = vcmask 1046528  }
  0x3a   : > { %v1647_v1 = vld [vmem:[#allocation5 + $0x38] sm:$0xff]  ;;  %459 = vmatpush.bf16.msra.mxu0 %v1655_v0  ;;  %v1646_v4 = vld [vmem:[#allocation5 + $0x30] sm:$0xff]  ;;  %v1653_v6 = vld [vmem:[#allocation5 + $0x68] sm:$0xff]  ;;  %vm397_vm1 = vsmask.f32 7424  ;;  %vm2003_vm4 = vmmov 1  }
  0x3b   : > { %v1663_v2 = vld [vmem:[#allocation5 + $0xb8] sm:$0xff]  ;;  %521 = vmatpush.bf16.msra.mxu1 %v1647_v1  ;;  %v1662_v5 = vld [vmem:[#allocation5 + $0xb0] sm:$0xff]  ;;  %v1645_v7 = vld [vmem:[#allocation5 + $0x28] sm:$0xff]  ;;  %s1712_s23 = sshll.u32 %s2067_s28, 4  ;;  %s348_s9 = scalar_lea.vmem [#allocation10], %s1329_s16 }
  0x3c   : > { %607 = vmatpush.bf16.msra.mxu2 %v1663_v2  ;;  %v1661_v8 = vld [vmem:[#allocation5 + $0xa8] sm:$0xff]  ;;  %v2175_v9 = vld [vmem:[%s302_s15] sm:$0xff]  ;;  %v1651_v18 = vld [vmem:[#allocation5 + $0x58] sm:$0xff]  ;;  %s1213_s21 = scalar_lea.hbm %s2260_s7, %s1712_s23  ;;  %s1214_s1 = sshll.u32 %s348_s9, 4  ;;  %s1215_s1 = int_to_ptr.vmem [resolvable:$true] %s1214_s1 }
  0x3d   : > { %v2177_v10 = vld [vmem:[%s302_s15 + $0x8] sm:$0xff]  ;;  %v1652_v11 = vld [vmem:[#allocation5 + $0x60] sm:$0xff]  ;;  %v354_v13 = vrot.slane %v2175_v9, 7  ;;  %v1650_v23 = vld [vmem:[#allocation5 + $0x50] sm:$0xff]  ;;  %s1216_s15 = sshll.u32 %s1213_s21, 4  ;;  %s1202_s28 = scalar_lea.sflag [#allocation4], %s2157_s22  ;;  %s1217_s15 = int_to_ptr.hbm [resolvable:$true] %s1216_s15 }
  0x3e   : > { %460 = vmatpush.bf16.msra.mxu0 %v1654_v3  ;;  %v1644_v12 = vld [vmem:[#allocation5 + $0x20] sm:$0xff]  ;;  %v355_v14 = vrot.slane %v2177_v10, 7  ;;  %v1643_v19 = vld [vmem:[#allocation5 + $0x18] sm:$0xff]  ;;  %v1642_v24 = vld [vmem:[#allocation5 + $0x10] sm:$0xff]  ;;  %s1934_s30 = sshra.s32 %s1217_s15, 4  ;;  %s1940_s10 = scalar_lea.hbm %s2260_s7, 32  ;;  %s1935_s30 = int_to_ptr.hbm [resolvable:$true] %s1934_s30 }
  0x3f   : > { %522 = vmatpush.bf16.msra.mxu1 %v1646_v4  ;;  %v1660_v15 = vld [vmem:[#allocation5 + $0xa0] sm:$0xff]  ;;  %v360_v17 = vsel %vm353_vm0, 0.0, %v354_v13  ;;  %v1659_v21 = vld [vmem:[#allocation5 + $0x98] sm:$0xff]  ;;  %v1658_v27 = vld [vmem:[#allocation5 + $0x90] sm:$0xff]  ;;  %s1936_s12 = scalar_lea.hbm %s1935_s30, 16  ;;  %p1941_p11 = scmp.lt.s32.totalorder %s1935_s30, %s2260_s7 }
  0x40   : > { %608 = vmatpush.bf16.msra.mxu2 %v1662_v5  ;;  %v356_v16 = vsel %vm353_vm0, %v354_v13, %v355_v14  ;;  %v361_v22 = vsel %vm353_vm0, %v355_v14, 0.0  ;;  %v1649_v28 = vld [vmem:[#allocation5 + $0x48] sm:$0xff]  ;;  %v1648_v34 = vld [vmem:[#allocation5 + $0x40] sm:$0xff]  ;;  %vm1398_vm2 = vmneg %vm353_vm0  ;;  %p1937_p1 = scmp.ne.s32.totalorder %s1935_s30, %s1936_s12  ;;  %p1942_p9 = scmp.lt.s32.totalorder %s1940_s10, %s1936_s12 }
  0x41   : > { %v362_v20 = vpack.c.bf16 %v356_v16, %v360_v17  ;;  %v379_v25 = vpack.c.bf16 %v361_v22, %v361_v22  ;;  %v1641_v29 = vld [vmem:[#allocation5 + $0x8] sm:$0xff]  ;;  %v1640_v35 = vld [vmem:[#allocation5] sm:$0xff]  ;;  %v1671_v41 = vld [vmem:[#allocation7 + $0x38] sm:$0xff]  ;;  %v1400_v43 = vpack.c.bf16 %v356_v16, %v354_v13 }
  0x42   : > { %461 = vmatpush.bf16.msra.mxu0 %v1653_v6  ;;  %v1657_v33 = vld [vmem:[#allocation5 + $0x88] sm:$0xff]  ;;  %v1656_v38 = vld [vmem:[#allocation5 + $0x80] sm:$0xff]  ;;  %v1687_v42 = vld [vmem:[#allocation7 + $0xb8] sm:$0xff]  ;;  %p1938_p4 = pnand %p1937_p1, %p2129_p7  ;;  %p1943_p2 = por %p1942_p9, %p1941_p11 }
  0x43   : > { %523 = vmatpush.bf16.msra.mxu1 %v1645_v7  ;;  %v401_v26 = vshll.u32 %v362_v20, 16  ;;  %v399_v30 = vshrl.u32 %v362_v20, 16  ;;  %v406_v32 = vshll.u32 %v379_v25, 16  ;;  %v555_v39 = vrot.slane %v362_v20, 1  ;;  %vm2186_vm5 = vmpackc.low %vm2003_vm4, %vm1398_vm2  ;;  %v1670_v47 = vld [vmem:[#allocation7 + $0x30] sm:$0xff]  ;;  %v1679_v48 = vld [vmem:[#allocation7 + $0x78] sm:$0xff] }
  0x44   : > { %609 = vmatpush.bf16.msra.mxu2 %v1661_v8  ;;  %v556_v40 = vrot.slane %v379_v25, 1  ;;  %v1686_v49 = vld [vmem:[#allocation7 + $0xb0] sm:$0xff]  ;;  %v1669_v50 = vld [vmem:[#allocation7 + $0x28] sm:$0xff]  ;;  %741 = vmatpush.bf16.msra.mxu3 %v1679_v48  ;;  %v1668_v53 = vld [vmem:[#allocation7 + $0x20] sm:$0xff]  ;;  %p1939_p8 = pneg %p1938_p4 }
  0x45   : > { %v403_v31 = vrot.slane %v401_v26, 1  ;;  %v408_v37 = vrot.slane %v406_v32, 1  ;;  %v1678_v51 = vld [vmem:[#allocation7 + $0x70] sm:$0xff]  ;;  %v1685_v52 = vld [vmem:[#allocation7 + $0xa8] sm:$0xff]  ;;  %v1684_v55 = vld [vmem:[#allocation7 + $0xa0] sm:$0xff] }
  0x46   : > { %462 = vmatpush.bf16.msra.mxu0 %v1652_v11  ;;  %v557_v46 = vsel %vm554_vm3, %v555_v39, %v556_v40  ;;  %v1677_v54 = vld [vmem:[#allocation7 + $0x68] sm:$0xff]  ;;  %v1667_v56 = vld [vmem:[#allocation7 + $0x18] sm:$0xff]  ;;  %v1676_v57 = vld [vmem:[#allocation7 + $0x60] sm:$0xff]  ;;  %p1944_p10 = pnand %p1943_p2, %p1939_p8 }
  0x47   : > { %524 = vmatpush.bf16.msra.mxu1 %v1644_v12  ;;  %v404_v36 = vor.u32 %v403_v31, %v399_v30  ;;  %v1683_v58 = vld [vmem:[#allocation7 + $0x98] sm:$0xff]  ;;  %v1666_v59 = vld [vmem:[#allocation7 + $0x10] sm:$0xff]  ;;  %v1665_v62 = vld [vmem:[#allocation7 + $0x8] sm:$0xff] }
  0x48   : > { %610 = vmatpush.bf16.msra.mxu2 %v1660_v15  ;;  %742 = vmatpush.bf16.msra.mxu3 %v1678_v51  ;;  %v1675_v60 = vld [vmem:[#allocation7 + $0x58] sm:$0xff]  ;;  %v1682_v61 = vld [vmem:[#allocation7 + $0x90] sm:$0xff]  ;;  %v1681_v0 = vld [vmem:[#allocation7 + $0x88] sm:$0xff] }
  0x49   : > { %v409_v44 = vsel %vm397_vm1, %v404_v36, %v408_v37  ;;  %v1674_v63 = vld [vmem:[#allocation7 + $0x50] sm:$0xff]  ;;  %v1664_v1 = vld [vmem:[#allocation7] sm:$0xff]  ;;  %v1673_v2 = vld [vmem:[#allocation7 + $0x48] sm:$0xff] }
  0x4a   : > { %463 = vmatpush.bf16.msra.mxu0 %v1651_v18  ;;  %v1680_v3 = vld [vmem:[#allocation7 + $0x80] sm:$0xff]  ;;  %v1693_v48 = vld [vmem:[#allocation8 + $0x28] sm:$0xff] }
  0x4b   : > { %525 = vmatpush.bf16.msra.mxu1 %v1643_v19  ;;  %v1672_v4 = vld [vmem:[#allocation7 + $0x40] sm:$0xff] }
  0x4c   : > { %611 = vmatpush.bf16.msra.mxu2 %v1659_v21  ;;  %743 = vmatpush.bf16.msra.mxu3 %v1677_v54  ;;  %v1797_v8 = vld [vmem:[%s2255_s2] ss:$0 sm:$0xff]  ;;  %v1691_v54 = vld [vmem:[#allocation8 + $0x18] sm:$0xff] }
  0x4d   : > { %v1692_v51 = vld [vmem:[#allocation8 + $0x20] sm:$0xff] }
  0x4e   : > { %464 = vmatpush.bf16.msra.mxu0 %v1650_v23 }
  0x4f   : > { %526 = vmatpush.bf16.msra.mxu1 %v1642_v24 }
  0x50   : > { %612 = vmatpush.bf16.msra.mxu2 %v1658_v27  ;;  %744 = vmatpush.bf16.msra.mxu3 %v1676_v57  ;;  %v1690_v57 = vld [vmem:[#allocation8 + $0x10] sm:$0xff] }
  0x52   : > { %465 = vmatpush.bf16.msra.mxu0 %v1649_v28 }
  0x53   : > { %527 = vmatpush.bf16.msra.mxu1 %v1641_v29 }
  0x54   : > { %613 = vmatpush.bf16.msra.mxu2 %v1657_v33  ;;  %745 = vmatpush.bf16.msra.mxu3 %v1675_v60  ;;  %v1689_v60 = vld [vmem:[#allocation8 + $0x8] sm:$0xff] }
  0x56   : > { %466 = vmatpush.bf16.msra.mxu0 %v1648_v34 }
  0x57   : > { %528 = vmatpush.bf16.msra.mxu1 %v1640_v35 }
  0x58   : > { %614 = vmatpush.bf16.msra.mxu2 %v1656_v38  ;;  %746 = vmatpush.bf16.msra.mxu3 %v1674_v63  ;;  %v1688_v63 = vld [vmem:[#allocation8] sm:$0xff] }
  0x59   : > { %467 = vmatmul.bf16.vlgmr.msra.gmra.mxu0 %v409_v44  ;;  %v1694_v44 = vld [vmem:[#allocation8 + $0x30] sm:$0xff] }
  0x5a   : > { %803 = vmatpush.bf16.msrb.mxu0 %v1671_v41  ;;  %1401 = vmatmul.msk.bf16.vlgmr.msra.gmra.mxu1 %vm2186_vm5, %v1400_v43  ;;  %v1711_v43 = vld [vmem:[#allocation8 + $0xb8] sm:$0xff] }
  0x5b   : > { %888 = vmatpush.bf16.msrb.mxu1 %v1687_v42  ;;  %615 = vmatmul.bf16.vlgmr.msra.gmra.mxu2 %v557_v46  ;;  %v1695_v42 = vld [vmem:[#allocation8 + $0x38] sm:$0xff] }
  0x5c   : > { %747 = vmatpush.bf16.msra.mxu3 %v1673_v2  ;;  %v1703_v46 = vld [vmem:[#allocation8 + $0x78] sm:$0xff]  ;;  %v1696_v2 = vld [vmem:[#allocation8 + $0x40] sm:$0xff] }
  0x5d   : > { %1022 = vmatpush.bf16.msrb.mxu2 %v1703_v46 }
  0x5e   : > { %804 = vmatpush.bf16.msrb.mxu0 %v1670_v47  ;;  %v1710_v47 = vld [vmem:[#allocation8 + $0xb0] sm:$0xff] }
  0x5f   : > { %889 = vmatpush.bf16.msrb.mxu1 %v1686_v49  ;;  %v1702_v49 = vld [vmem:[#allocation8 + $0x70] sm:$0xff] }
  0x60   : > { %748 = vmatpush.bf16.msra.mxu3 %v1672_v4 }
  0x61   : > { %1023 = vmatpush.bf16.msrb.mxu2 %v1702_v49 }
  0x62   : > { %805 = vmatpush.bf16.msrb.mxu0 %v1669_v50  ;;  %v1709_v50 = vld [vmem:[#allocation8 + $0xa8] sm:$0xff] }
  0x63   : > { %890 = vmatpush.bf16.msrb.mxu1 %v1685_v52  ;;  %v1701_v52 = vld [vmem:[#allocation8 + $0x68] sm:$0xff] }
  0x64   : > { %1084 = vmatpush.bf16.msrb.mxu3 %v1695_v42 }
  0x65   : > { %1024 = vmatpush.bf16.msrb.mxu2 %v1701_v52 }
  0x66   : > { %806 = vmatpush.bf16.msrb.mxu0 %v1668_v53  ;;  %v1708_v53 = vld [vmem:[#allocation8 + $0xa0] sm:$0xff] }
  0x67   : > { %891 = vmatpush.bf16.msrb.mxu1 %v1684_v55  ;;  %v1700_v55 = vld [vmem:[#allocation8 + $0x60] sm:$0xff] }
  0x68   : > { %1085 = vmatpush.bf16.msrb.mxu3 %v1694_v44 }
  0x69   : > { %1025 = vmatpush.bf16.msrb.mxu2 %v1700_v55 }
  0x6a   : > { %807 = vmatpush.bf16.msrb.mxu0 %v1667_v56  ;;  %v1707_v56 = vld [vmem:[#allocation8 + $0x98] sm:$0xff] }
  0x6b   : > { %892 = vmatpush.bf16.msrb.mxu1 %v1683_v58  ;;  %v1699_v58 = vld [vmem:[#allocation8 + $0x58] sm:$0xff] }
  0x6c   : > { %1086 = vmatpush.bf16.msrb.mxu3 %v1693_v48 }
  0x6d   : > { %1026 = vmatpush.bf16.msrb.mxu2 %v1699_v58 }
  0x6e   : > { %808 = vmatpush.bf16.msrb.mxu0 %v1666_v59  ;;  %v1706_v59 = vld [vmem:[#allocation8 + $0x90] sm:$0xff] }
  0x6f   : > { %893 = vmatpush.bf16.msrb.mxu1 %v1682_v61  ;;  %v1698_v61 = vld [vmem:[#allocation8 + $0x50] sm:$0xff] }
  0x70   : > { %1087 = vmatpush.bf16.msrb.mxu3 %v1692_v51 }
  0x71   : > { %1027 = vmatpush.bf16.msrb.mxu2 %v1698_v61 }
  0x72   : > { %809 = vmatpush.bf16.msrb.mxu0 %v1665_v62  ;;  %v1705_v62 = vld [vmem:[#allocation8 + $0x88] sm:$0xff] }
  0x73   : > { %894 = vmatpush.bf16.msrb.mxu1 %v1681_v0  ;;  %v1697_v0 = vld [vmem:[#allocation8 + $0x48] sm:$0xff] }
  0x74   : > { %1088 = vmatpush.bf16.msrb.mxu3 %v1691_v54 }
  0x75   : > { %1028 = vmatpush.bf16.msrb.mxu2 %v1697_v0 }
  0x76   : > { %810 = vmatpush.bf16.msrb.mxu0 %v1664_v1  ;;  %v1704_v1 = vld [vmem:[#allocation8 + $0x80] sm:$0xff] }
  0x77   : > { %895 = vmatpush.bf16.msrb.mxu1 %v1680_v3 }
  0x78   : > { %1089 = vmatpush.bf16.msrb.mxu3 %v1690_v57 }
  0x79   : > { %1029 = vmatpush.bf16.msrb.mxu2 %v1696_v2 }
  0x7a   : > { %1169 = vmatpush.bf16.msra.mxu0 %v1711_v43  ;;  %v1799_v43 = vld [vmem:[%s2259_s6] ss:$0 sm:$0xff] }
  0x7c   : > { %1090 = vmatpush.bf16.msrb.mxu3 %v1689_v60 }
  0x7e   : > { %1170 = vmatpush.bf16.msra.mxu0 %v1710_v47 }
  0x80   : > { %1091 = vmatpush.bf16.msrb.mxu3 %v1688_v63 }
  0x82   : > { %1171 = vmatpush.bf16.msra.mxu0 %v1709_v50 }
  0x86   : > { %1172 = vmatpush.bf16.msra.mxu0 %v1708_v53 }
  0x8a   : > { %1173 = vmatpush.bf16.msra.mxu0 %v1707_v56 }
  0x8e   : > { %1174 = vmatpush.bf16.msra.mxu0 %v1706_v59 }
  0x92   : > { %1175 = vmatpush.bf16.msra.mxu0 %v1705_v62 }
  0x96   : > { %1176 = vmatpush.bf16.msra.mxu0 %v1704_v1 }
  0xd6   : > { %v468_v5 = vpop.f32.mrf.mxu0 }
  0xd7   : > { %v530_v6 = vpop.f32.mrf.mxu1 }
  0xd8   : > { %v531_v7 = vadd.f32 %v530_v6, %v468_v5 }
  0xde   : > { %v616_v11 = vpop.f32.mrf.mxu2  ;;  %v470_v14 = vpop.f32.mrf.mxu0 }
  0xdf   : > { %v621_v12 = vadd.f32 %v616_v11, %v531_v7  ;;  %v532_v15 = vpop.f32.mrf.mxu1  ;;  %v1798_v7 = vld [vmem:[%s2257_s4] ss:$0 sm:$0xff] }
  0xe0   : > { %v533_v17 = vadd.f32 %v532_v15, %v470_v14 }
  0xe1   : > { %v627_v13 = vadd.f32 %v1797_v8, %v621_v12 }
  0xe3   : > { %v631_v16 = vmul.f32 0.1, %v627_v13  ;;  %vm629_vm6 = vcmp.gt.f32.partialorder %v627_v13, 0.0 }
  0xe5   : > { %v633_v20 = vsel %vm629_vm6, %v627_v13, %v631_v16 }
  0xe6   : > { %v618_v18 = vpop.f32.mrf.mxu2  ;;  %v637_v23 = vrot.slane %v633_v20, 7 }
  0xe7   : > { %v622_v19 = vadd.f32 %v618_v18, %v533_v17 }
  0xe8   : > { %v643_v27 = vsel %vm353_vm0, 0.0, %v637_v23 }
  0xe9   : > { %v628_v21 = vadd.f32 %v1797_v8, %v622_v19 }
  0xeb   : > { %vm630_vm7 = vcmp.gt.f32.partialorder %v628_v21, 0.0  ;;  %v632_v22 = vmul.f32 0.1, %v628_v21 }
  0xed   : > { %v634_v24 = vsel %vm630_vm7, %v628_v21, %v632_v22 }
  0xee   : > { %v638_v25 = vrot.slane %v634_v24, 7 }
  0xf0   : > { %v639_v26 = vsel %vm353_vm0, %v637_v23, %v638_v25  ;;  %v644_v28 = vsel %vm353_vm0, %v638_v25, 0.0 }
  0xf1   : > { %v645_v29 = vpack.c.bf16 %v639_v26, %v643_v27  ;;  %v1500_v30 = vpack.c.bf16 %v639_v26, %v637_v23  ;;  %v662_v31 = vpack.c.bf16 %v644_v28, %v644_v28 }
  0xf3   : > { %1501 = vmatmul.msk.bf16.vlgmr.msrb.gmra.mxu0 %vm2186_vm5, %v1500_v30  ;;  %v836_v32 = vrot.slane %v645_v29, 1  ;;  %v837_v33 = vrot.slane %v662_v31, 1  ;;  %v683_v34 = vshll.u32 %v645_v29, 16  ;;  %v688_v35 = vshll.u32 %v662_v31, 16 }
  0xf4   : > { %v681_v37 = vshrl.u32 %v645_v29, 16 }
  0xf5   : > { %v838_v36 = vsel %vm554_vm3, %v836_v32, %v837_v33  ;;  %v685_v38 = vrot.slane %v683_v34, 1  ;;  %v690_v40 = vrot.slane %v688_v35, 1 }
  0xf6   : > { %896 = vmatmul.bf16.vlgmr.msrb.gmra.mxu1 %v838_v36 }
  0xf7   : > { %v686_v39 = vor.u32 %v685_v38, %v681_v37 }
  0xf9   : > { %v691_v41 = vsel %vm397_vm1, %v686_v39, %v690_v40 }
  0xfa   : > { %749 = vmatmul.bf16.vlgmr.msra.gmra.mxu3 %v691_v41 }
 0x170   : > { %v812_v3 = vpop.f32.mrf.mxu0 }
 0x173   : > { %v897_v4 = vpop.f32.mrf.mxu1 }
 0x178   : > { %v814_v12 = vpop.f32.mrf.mxu0 }
 0x17b   : > { %v899_v16 = vpop.f32.mrf.mxu1 }
 0x17d   : > { %v750_v5 = vpop.f32.mrf.mxu3 }
 0x17e   : > { %v813_v6 = vadd.f32 %v812_v3, %v750_v5 }
 0x180   : > { %v902_v8 = vadd.f32 %v897_v4, %v813_v6 }
 0x182   : > { %v908_v11 = vadd.f32 %v1798_v7, %v902_v8 }
 0x184   : > { %v912_v14 = vmul.f32 0.1, %v908_v11  ;;  %vm910_vm8 = vcmp.gt.f32.partialorder %v908_v11, 0.0 }
 0x185   : > { %v752_v13 = vpop.f32.mrf.mxu3 }
 0x186   : > { %v815_v15 = vadd.f32 %v814_v12, %v752_v13  ;;  %v914_v18 = vsel %vm910_vm8, %v908_v11, %v912_v14 }
 0x187   : > { %v918_v21 = vrot.slane %v914_v18, 7 }
 0x188   : > { %v903_v17 = vadd.f32 %v899_v16, %v815_v15 }
 0x189   : > { %v924_v25 = vsel %vm353_vm0, 0.0, %v918_v21 }
 0x18a   : > { %v909_v19 = vadd.f32 %v1798_v7, %v903_v17 }
 0x18c   : > { %vm911_vm9 = vcmp.gt.f32.partialorder %v909_v19, 0.0  ;;  %v913_v20 = vmul.f32 0.1, %v909_v19 }
 0x18e   : > { %v915_v22 = vsel %vm911_vm9, %v909_v19, %v913_v20 }
 0x18f   : > { %v919_v23 = vrot.slane %v915_v22, 7 }
 0x191   : > { %v920_v24 = vsel %vm353_vm0, %v918_v21, %v919_v23  ;;  %v925_v26 = vsel %vm353_vm0, %v919_v23, 0.0 }
 0x192   : > { %v926_v27 = vpack.c.bf16 %v920_v24, %v924_v25  ;;  %v1600_v28 = vpack.c.bf16 %v920_v24, %v918_v21  ;;  %v943_v29 = vpack.c.bf16 %v925_v26, %v925_v26 }
 0x194   : > { %1601 = vmatmul.msk.bf16.vlgmr.msrb.gmra.mxu3 %vm2186_vm5, %v1600_v28  ;;  %v1117_v30 = vrot.slane %v926_v27, 1  ;;  %v1118_v31 = vrot.slane %v943_v29, 1  ;;  %v964_v32 = vshll.u32 %v926_v27, 16  ;;  %v969_v33 = vshll.u32 %v943_v29, 16 }
 0x195   : > { %v962_v35 = vshrl.u32 %v926_v27, 16 }
 0x196   : > { %v1119_v34 = vsel %vm554_vm3, %v1117_v30, %v1118_v31  ;;  %v966_v36 = vrot.slane %v964_v32, 1  ;;  %v971_v38 = vrot.slane %v969_v33, 1 }
 0x197   : > { %1177 = vmatmul.bf16.vlgmr.msra.gmra.mxu0 %v1119_v34 }
 0x198   : > { %v967_v37 = vor.u32 %v966_v36, %v962_v35 }
 0x19a   : > { %v972_v39 = vsel %vm397_vm1, %v967_v37, %v971_v38 }
 0x19b   : > { %1030 = vmatmul.bf16.vlgmr.msrb.gmra.mxu2 %v972_v39 }
 0x214   : > { %v1178_v41 = vpop.f32.mrf.mxu0 }
 0x217   : > { %v1093_v40 = vpop.f32.mrf.mxu3 }
 0x21c   : > { %v1180_v52 = vpop.f32.mrf.mxu0 }
 0x21e   : > { %v1031_v42 = vpop.f32.mrf.mxu2 }
 0x21f   : > { %v1094_v45 = vadd.f32 %v1093_v40, %v1031_v42  ;;  %v1095_v48 = vpop.f32.mrf.mxu3 }
 0x221   : > { %v1183_v44 = vadd.f32 %v1178_v41, %v1094_v45 }
 0x223   : > { %v1189_v46 = vadd.f32 %v1799_v43, %v1183_v44 }
 0x225   : > { %v1191_v47 = vadd.f32 %v1189_v46, %v2175_v9 }
 0x226   : > { %v1033_v49 = vpop.f32.mrf.mxu2 }
 0x227   : > { %vm1193_vm10 = vcmp.gt.f32.partialorder %v1191_v47, 0.0  ;;  %v1195_v50 = vmul.f32 0.1, %v1191_v47  ;;  %v1096_v51 = vadd.f32 %v1095_v48, %v1033_v49 }
 0x229   : > { %v1197_v53 = vsel %vm1193_vm10, %v1191_v47, %v1195_v50  ;;  %v1184_v54 = vadd.f32 %v1180_v52, %v1096_v51 }
 0x22a   : > { %1199 = vst [vmem:[%s348_s9] sm:$0xff] %v1197_v53 }
 0x22b   : > { %v1190_v55 = vadd.f32 %v1799_v43, %v1184_v54 }
 0x22d   : > { %v1192_v9 = vadd.f32 %v1190_v55, %v2177_v10 }
 0x22f   : > { %vm1194_vm11 = vcmp.gt.f32.partialorder %v1192_v9, 0.0  ;;  %v1196_v56 = vmul.f32 0.1, %v1192_v9 }
 0x231   : > { %v1198_v57 = vsel %vm1194_vm11, %v1192_v9, %v1196_v56 }
 0x232   : > { %1200 = vst [vmem:[%s348_s9 + $0x8] sm:$0xff] %v1198_v57 }
 0x233   : > { %1947 = shalt.err (!%p1944_p10)
}
 0x234   : > { %s2004_s22 = smov 128   ;;  %s2005_s23 = smov 8  }
 0x235   : > { %1727 = dma.vmem_to_hbm [thread:$0]  (%p2129_p7), %s1215_s1, 256, %s1217_s15, %s1202_s28, %s2004_s22, %s2004_s22, %s2005_s23  }
 0x236 PF: > { %s1231_s19 = sand.u32 1, %s1982_s24   ;;  %p2271_p12 = scmp.ge.s32.totalorder %s1994_s27, 2 }
 0x237   : > { %s1232_s20 = scalar_lea.sflag [#allocation4], %s1231_s19 }
 0x238   : > { %p1744_p13 = pnand %p2271_p12, %p2081_p6 }
 0x23a   : > { %p1745_p0 = pneg %p1744_p13 }
 0x23c   : > { %1977 = dma.done.wait (%p1745_p0), %s1232_s20, 256  }
 0x23d   : > { %1979 = vsyncadd (%p1745_p0), %s1232_s20, 4294967040  ;;  %p22_p3 = scmp.ge.s32.totalorder %s2113_s11, 4   ;;  %s2272_s24 = smov %s1986_s25 }
 0x23e   : > { %s2273_s25 = smov %s1990_s26  ;;  %s2274_s26 = smov %s2125_s17 }
 0x23f   : > { %s2275_s27 = smov %s2113_s11  ;;  %24 = sbr.rel (!%p22_p3) target bundleno = 9 (0x9), region = 111 }
 0x244   :  { %1238 = vsyncpa [#allocation3], 1 }
 0x245   :  { %1240 = vsyncpa [#allocation3 + $0x1], 1 }
 0x246   :  { %1241 = vsyncpa [#allocation6], 1 }
 0x247   :  { %1242 = vsyncpa [#allocation9], 1 }
 0x248   :  { %1243 = vsyncpa [#allocation4], 1 }
 0x249   :  { %1245 = vsyncpa [#allocation4 + $0x1], 1 }

</bundles_post_ra>
